<compile_context>
chip_gen: v7x
topology: tpu7x:2x2x1
jax: 0.10.0
libtpu: 0.0.40
codegen_flags: <defaults>
</compile_context>

<pallas_src>
import functools

import jax
import jax.numpy as jnp
import numpy as np
from jax import lax
from jax.experimental import pallas as pl
from jax.experimental.pallas import tpu as pltpu


# ------------------------------- stage 1 ----------------------------------- #

def _proj_kernel(x_ref, woT_ref, bo_ref, wpT_ref, bp_ref, zn_ref, *,
                 bn_eps, mxu_dtype):
    x = x_ref[...]                                   # [B, p] f32
    woT = woT_ref[...]                               # [p, m]
    bo = bo_ref[...]                                 # [1, m]

    z = jnp.dot(x.astype(mxu_dtype), woT.astype(mxu_dtype),
                preferred_element_type=jnp.float32) + bo            # [B, m] f32

    # BatchNorm1d (training mode: per-call batch stats, gamma=1, beta=0, biased
    # variance). Fused single-sweep statistics: var = E[z^2] - E[z]^2.
    inv_b = 1.0 / z.shape[0]
    s1 = jnp.sum(z, axis=0, keepdims=True)
    s2 = jnp.sum(z * z, axis=0, keepdims=True)
    mean = s1 * inv_b
    var = jnp.maximum(s2 * inv_b - mean * mean, 0.0)
    z = (z - mean) * lax.rsqrt(var + bn_eps)

    # SymReLU(x, b) = relu(x - b) - relu(-x - b)  (symmetric soft-threshold).
    # TODO(synk): SymReLU class body was not included in the reference snippet;
    #             this is the common symmetric-ReLU-with-threshold definition.
    z = jnp.maximum(z - bo, 0.0) - jnp.maximum(-z - bo, 0.0)

    # Predictor Wp.
    z = jnp.dot(z.astype(mxu_dtype), wpT_ref[...].astype(mxu_dtype),
                preferred_element_type=jnp.float32) + bp_ref[...]

    # L2-normalize once here so the loss kernel only does dot products.
    inv_norm = lax.rsqrt(jnp.sum(z * z, axis=-1, keepdims=True) + 1e-12)
    zn_ref[...] = z * inv_norm


# ------------------------------- stage 2 ----------------------------------- #

def _ntxent_kernel(q_ref, k_ref, pq_ref, row_loss_ref, m_scr, l_scr, *,
                   inv_temp, tq, tk, mxu_dtype):
    qi = pl.program_id(0)
    ki = pl.program_id(1)

    @pl.when(ki == 0)
    def _():
        m_scr[...] = jnp.full_like(m_scr, -jnp.inf)
        l_scr[...] = jnp.zeros_like(l_scr)

    q = q_ref[...]                                   # [tq, m] f32 (resident per qi)
    k = k_ref[...]                                   # [tk, m] f32
    s = lax.dot_general(q.astype(mxu_dtype), k.astype(mxu_dtype),
                        (((1,), (1,)), ((), ())),
                        preferred_element_type=jnp.float32) * inv_temp   # [tq, tk]

    # Self-similarity mask: only the block on the global diagonal ever matches;
    # only small [tq, tk] iotas are materialized (never [N, N]).
    row_g = qi * tq + lax.broadcasted_iota(jnp.int32, (tq, tk), 0)
    col_g = ki * tk + lax.broadcasted_iota(jnp.int32, (tq, tk), 1)
    s = jnp.where(row_g == col_g, -1e30, s)

    # Online (streaming) logsumexp update across key blocks.
    m_prev = m_scr[...]
    m_new = jnp.maximum(m_prev, jnp.max(s, axis=-1, keepdims=True))
    l_scr[...] = (l_scr[...] * jnp.exp(m_prev - m_new)
                  + jnp.sum(jnp.exp(s - m_new), axis=-1, keepdims=True))
    m_scr[...] = m_new

    @pl.when(ki == pl.num_programs(1) - 1)
    def _():
        lse = m_scr[...] + jnp.log(l_scr[...])
        # Positive logit = <zn_row, zn_partner_row> / T (f32); no [N,N] partner
        # mask and no full-row masked reduce.
        pos = jnp.sum(q * pq_ref[...], axis=-1, keepdims=True) * inv_temp
        row_loss_ref[...] = lse - pos


# ------------------------------- wrapper ----------------------------------- #

def _pick_row_tile(batch_size, max_tile=256):
    """Largest multiple-of-8 divisor of batch_size that is <= max_tile."""
    for t in range(min(max_tile, batch_size), 7, -1):
        if batch_size % t == 0 and t % 8 == 0:
            return t
    raise ValueError(f"batch_size must have a multiple-of-8 divisor, got {batch_size}")


def simclr_orig_forward(x1, x2, wo, bo, wp, bp, *, temperature=0.05,
                        bn_eps=1e-5, mxu_dtype=jnp.bfloat16, max_row_tile=256):
    """wo: [m, p] (torch Linear layout), bo: [m], wp: [m, m], bp: [m]."""
    B, p = x1.shape
    m = wo.shape[0]
    N = 2 * B

    # ---- stage 1: projection (grid over the 2 views; BN needs full-batch stats)
    # TODO(synk): for very large B, switch to a two-pass batch-tiled BN
    #             (accumulate per-feature sum/sumsq over a batch grid axis first).
    xs = jnp.stack([x1, x2], axis=0)                 # [2, B, p]
    proj_kernel = functools.partial(_proj_kernel, bn_eps=bn_eps,
                                    mxu_dtype=mxu_dtype)
    zn = pl.pallas_call(
        proj_kernel,
        out_shape=jax.ShapeDtypeStruct((2, B, m), jnp.float32),
        grid=(2,),
        in_specs=[
            pl.BlockSpec((None, B, p), lambda v: (v, 0, 0)),   # x (per view)
            pl.BlockSpec((p, m), lambda v: (0, 0)),            # Wo^T
            pl.BlockSpec((1, m), lambda v: (0, 0)),            # Wo bias row
            pl.BlockSpec((m, m), lambda v: (0, 0)),            # Wp^T
            pl.BlockSpec((1, m), lambda v: (0, 0)),            # Wp bias row
        ],
        out_specs=pl.BlockSpec((None, B, m), lambda v: (v, 0, 0)),
        compiler_params=pltpu.CompilerParams(dimension_semantics=("parallel",)),
    )(xs, wo.T, bo.reshape(1, m), wp.T, bp.reshape(1, m))

    zn = zn.reshape(N, m)                            # [zo_n ; zt_n]; free reshape

    # ---- stage 2: tiled NT-Xent, streaming logsumexp over key blocks ----
    tq = _pick_row_tile(B, max_row_tile)             # query tile == key tile
    nq = N // tq                                     # query/key blocks total
    nb = B // tq                                     # blocks per view
    # TODO(synk): exploit sim symmetry (reuse S_ot for the zt-query rows) for
    #             another ~25% MXU flop saving.
    ntxent_kernel = functools.partial(
        _ntxent_kernel, inv_temp=1.0 / temperature, tq=tq, tk=tq,
        mxu_dtype=mxu_dtype)
    row_loss = pl.pallas_call(
        ntxent_kernel,
        out_shape=jax.ShapeDtypeStruct((N, 1), jnp.float32),
        grid=(nq, nq),
        in_specs=[
            pl.BlockSpec((tq, m), lambda qi, ki: (qi, 0)),              # query rows
            pl.BlockSpec((tq, m), lambda qi, ki: (ki, 0)),              # key rows
            pl.BlockSpec((tq, m), lambda qi, ki: ((qi + nb) % nq, 0)),  # partner rows
        ],
        out_specs=pl.BlockSpec((tq, 1), lambda qi, ki: (qi, 0)),
        scratch_shapes=[pltpu.VMEM((tq, 1), jnp.float32),   # running max
                        pltpu.VMEM((tq, 1), jnp.float32)],  # running exp-sum
        compiler_params=pltpu.CompilerParams(
            dimension_semantics=("parallel", "arbitrary")),
    )(zn, zn, zn)

    return jnp.sum(row_loss) / N


# ------------------------------ reference ----------------------------------- #

def _reference_forward(x1, x2, wo, bo, wp, bp, *, temperature=0.05, bn_eps=1e-5):
    """Pure-JAX reference with identical semantics (for sanity check)."""
    B = x1.shape[0]
    N = 2 * B

    def lin(x, w, b):
        return x @ w.T + b

    def bn(z):
        mean = jnp.mean(z, axis=0, keepdims=True)
        var = jnp.mean((z - mean) ** 2, axis=0, keepdims=True)
        return (z - mean) / jnp.sqrt(var + bn_eps)

    def srelu(x, b):
        return jnp.maximum(x - b, 0.0) - jnp.maximum(-x - b, 0.0)

    zo = srelu(bn(lin(x1, wo, bo)), bo)
    zt = srelu(bn(lin(x2, wo, bo)), bo)
    zo = lin(zo, wp, bp)
    zt = lin(zt, wp, bp)
    z = jnp.concatenate([zo, zt], axis=0)
    zn = z / jnp.sqrt(jnp.sum(z * z, axis=-1, keepdims=True) + 1e-12)
    sim = zn @ zn.T / temperature
    idx = jnp.arange(N)
    masked = jnp.where(idx[:, None] == idx[None, :], -1e30, sim)
    lse = jax.scipy.special.logsumexp(masked, axis=-1)
    pos = sim[idx, (idx + B) % N]
    return jnp.sum(lse - pos) / N


if __name__ == "__main__":
    # Small, forward-consistent shapes: batch=8, input dim p=16, hidden m=32.
    B, p, m = 8, 16, 32
    temperature = 0.05

    key = jax.random.PRNGKey(0)
    k1, k2, k3, k4, k5, k6 = jax.random.split(key, 6)

    x1 = jax.random.normal(k1, (B, p), dtype=jnp.float32)
    x2 = jax.random.normal(k2, (B, p), dtype=jnp.float32)

    # Deterministic parameter init (Wo_init analogue + torch-Linear-style bias scale).
    wo = jax.random.normal(k3, (m, p), dtype=jnp.float32) / np.sqrt(p)   # Wo.weight [m, p]
    bo = jax.random.uniform(k4, (m,), jnp.float32, -1.0, 1.0) / np.sqrt(p)
    wp = jax.random.normal(k5, (m, m), dtype=jnp.float32) / np.sqrt(m)   # Wp.weight [m, m]
    bp = jax.random.uniform(k6, (m,), jnp.float32, -1.0, 1.0) / np.sqrt(m)

    ref = _reference_forward(x1, x2, wo, bo, wp, bp, temperature=temperature)

    # f32-operand MXU path: tight check against the f32 reference.
    loss_f32 = jax.block_until_ready(
        simclr_orig_forward(x1, x2, wo, bo, wp, bp, temperature=temperature,
                            mxu_dtype=jnp.float32))
    np.testing.assert_allclose(np.asarray(loss_f32), np.asarray(ref),
                               rtol=1e-3, atol=1e-3)

    # bf16-operand MXU path (default / perf): looser tolerance since bf16
    # rounding is amplified by the 1/temperature = 20 logit scaling.
    loss_bf16 = jax.block_until_ready(
        simclr_orig_forward(x1, x2, wo, bo, wp, bp, temperature=temperature,
                            mxu_dtype=jnp.bfloat16))
    assert np.isfinite(np.asarray(loss_bf16))
    np.testing.assert_allclose(np.asarray(loss_bf16), np.asarray(ref),
                               rtol=1.5e-1, atol=1.5e-1)

    print("KERNEL_OK")
</pallas_src>

<mosaic_0001>
module attributes {stable_mosaic.version = 11 : i64} {
  func.func @_proj_kernel(%arg0: i32, %arg1: memref<1x8x16xf32, #tpu.memory_space<vmem>>, %arg2: memref<16x32xf32, #tpu.memory_space<vmem>>, %arg3: memref<1x32xf32, #tpu.memory_space<vmem>>, %arg4: memref<32x32xf32, #tpu.memory_space<vmem>>, %arg5: memref<1x32xf32, #tpu.memory_space<vmem>>, %arg6: memref<1x8x32xf32, #tpu.memory_space<vmem>>) attributes {dimension_semantics = [#tpu.dimension_semantics<parallel>], iteration_bounds = array<i64: 2>, scalar_prefetch = 0 : i64, scratch_operands = 0 : i64, tpu.core_type = #tpu.core_type<tc>, window_params = [{transform_indices = @transform_0, window_bounds = array<i64: 1, 8, 16>}, {pipeline_mode = #tpu.pipeline_mode<synchronous>, transform_indices = @transform_1, window_bounds = array<i64: 16, 32>}, {pipeline_mode = #tpu.pipeline_mode<synchronous>, transform_indices = @transform_2, window_bounds = array<i64: 1, 32>}, {pipeline_mode = #tpu.pipeline_mode<synchronous>, transform_indices = @transform_3, window_bounds = array<i64: 32, 32>}, {pipeline_mode = #tpu.pipeline_mode<synchronous>, transform_indices = @transform_4, window_bounds = array<i64: 1, 32>}, {transform_indices = @transform_5, window_bounds = array<i64: 1, 8, 32>}]} {
    %c0 = arith.constant 0 : index
    %c0_0 = arith.constant 0 : index
    %c0_1 = arith.constant 0 : index
    %0 = vector.load %arg1[%c0, %c0_0, %c0_1] : memref<1x8x16xf32, #tpu.memory_space<vmem>>, vector<1x8x16xf32>
    %1 = vector.shape_cast %0 : vector<1x8x16xf32> to vector<8x16xf32>
    %c0_2 = arith.constant 0 : index
    %c0_3 = arith.constant 0 : index
    %2 = vector.load %arg2[%c0_2, %c0_3] : memref<16x32xf32, #tpu.memory_space<vmem>>, vector<16x32xf32>
    %c0_4 = arith.constant 0 : index
    %c0_5 = arith.constant 0 : index
    %3 = vector.load %arg3[%c0_4, %c0_5] : memref<1x32xf32, #tpu.memory_space<vmem>>, vector<1x32xf32>
    %cst = arith.constant dense<0.000000e+00> : vector<8x32xf32>
    %4 = tpu.matmul %1, %2, %cst {dimension_numbers = #tpu.dot_dimension_numbers<[1], [0], [0], [1], [0, 0, 1, 1], [], []>} : vector<8x16xf32>, vector<16x32xf32>, vector<8x32xf32> -> vector<8x32xf32>
    %5 = vector.broadcast %3 : vector<1x32xf32> to vector<8x32xf32>
    %6 = arith.addf %4, %5 : vector<8x32xf32>
    %cst_6 = arith.constant dense<0.000000e+00> : vector<32xf32>
    %7 = vector.multi_reduction <add>, %6, %cst_6 [0] : vector<8x32xf32> to vector<32xf32>
    %8 = vector.shape_cast %7 : vector<32xf32> to vector<1x32xf32>
    %9 = arith.mulf %6, %6 : vector<8x32xf32>
    %cst_7 = arith.constant dense<0.000000e+00> : vector<32xf32>
    %10 = vector.multi_reduction <add>, %9, %cst_7 [0] : vector<8x32xf32> to vector<32xf32>
    %11 = vector.shape_cast %10 : vector<32xf32> to vector<1x32xf32>
    %cst_8 = arith.constant 1.250000e-01 : f32
    %12 = vector.broadcast %cst_8 : f32 to vector<1x32xf32>
    %13 = arith.mulf %8, %12 : vector<1x32xf32>
    %cst_9 = arith.constant 1.250000e-01 : f32
    %14 = vector.broadcast %cst_9 : f32 to vector<1x32xf32>
    %15 = arith.mulf %11, %14 : vector<1x32xf32>
    %16 = arith.mulf %13, %13 : vector<1x32xf32>
    %17 = arith.subf %15, %16 : vector<1x32xf32>
    %cst_10 = arith.constant 0.000000e+00 : f32
    %18 = vector.broadcast %cst_10 : f32 to vector<1x32xf32>
    %19 = arith.maximumf %17, %18 : vector<1x32xf32>
    %20 = vector.broadcast %13 : vector<1x32xf32> to vector<8x32xf32>
    %21 = arith.subf %6, %20 : vector<8x32xf32>
    %cst_11 = arith.constant 9.99999974E-6 : f32
    %22 = vector.broadcast %cst_11 : f32 to vector<1x32xf32>
    %23 = arith.addf %19, %22 : vector<1x32xf32>
    %24 = math.rsqrt %23 : vector<1x32xf32>
    %25 = vector.broadcast %24 : vector<1x32xf32> to vector<8x32xf32>
    %26 = arith.mulf %21, %25 : vector<8x32xf32>
    %27 = vector.broadcast %3 : vector<1x32xf32> to vector<8x32xf32>
    %28 = arith.subf %26, %27 : vector<8x32xf32>
    %cst_12 = arith.constant 0.000000e+00 : f32
    %29 = vector.broadcast %cst_12 : f32 to vector<8x32xf32>
    %30 = arith.maximumf %28, %29 : vector<8x32xf32>
    %cst_13 = arith.constant 0.000000e+00 : f32
    %31 = vector.broadcast %cst_13 : f32 to vector<8x32xf32>
    %32 = arith.subf %31, %26 : vector<8x32xf32>
    %33 = vector.broadcast %3 : vector<1x32xf32> to vector<8x32xf32>
    %34 = arith.subf %32, %33 : vector<8x32xf32>
    %cst_14 = arith.constant 0.000000e+00 : f32
    %35 = vector.broadcast %cst_14 : f32 to vector<8x32xf32>
    %36 = arith.maximumf %34, %35 : vector<8x32xf32>
    %37 = arith.subf %30, %36 : vector<8x32xf32>
    %c0_15 = arith.constant 0 : index
    %c0_16 = arith.constant 0 : index
    %38 = vector.load %arg4[%c0_15, %c0_16] : memref<32x32xf32, #tpu.memory_space<vmem>>, vector<32x32xf32>
    %cst_17 = arith.constant dense<0.000000e+00> : vector<8x32xf32>
    %39 = tpu.matmul %37, %38, %cst_17 {dimension_numbers = #tpu.dot_dimension_numbers<[1], [0], [0], [1], [0, 0, 1, 1], [], []>} : vector<8x32xf32>, vector<32x32xf32>, vector<8x32xf32> -> vector<8x32xf32>
    %c0_18 = arith.constant 0 : index
    %c0_19 = arith.constant 0 : index
    %40 = vector.load %arg5[%c0_18, %c0_19] : memref<1x32xf32, #tpu.memory_space<vmem>>, vector<1x32xf32>
    %41 = vector.broadcast %40 : vector<1x32xf32> to vector<8x32xf32>
    %42 = arith.addf %39, %41 : vector<8x32xf32>
    %43 = arith.mulf %42, %42 : vector<8x32xf32>
    %cst_20 = arith.constant dense<0.000000e+00> : vector<8xf32>
    %44 = vector.multi_reduction <add>, %43, %cst_20 [1] : vector<8x32xf32> to vector<8xf32>
    %45 = vector.shape_cast %44 : vector<8xf32> to vector<8x1xf32>
    %cst_21 = arith.constant 9.99999996E-13 : f32
    %46 = vector.broadcast %cst_21 : f32 to vector<8x1xf32>
    %47 = arith.addf %45, %46 : vector<8x1xf32>
    %48 = math.rsqrt %47 : vector<8x1xf32>
    %49 = vector.broadcast %48 : vector<8x1xf32> to vector<8x32xf32>
    %50 = arith.mulf %42, %49 : vector<8x32xf32>
    %c0_22 = arith.constant 0 : index
    %c0_23 = arith.constant 0 : index
    %c0_24 = arith.constant 0 : index
    %51 = vector.load %arg6[%c0_22, %c0_23, %c0_24] : memref<1x8x32xf32, #tpu.memory_space<vmem>>, vector<1x8x32xf32>
    %52 = vector.shape_cast %51 : vector<1x8x32xf32> to vector<8x32xf32>
    %53 = vector.shape_cast %50 : vector<8x32xf32> to vector<1x8x32xf32>
    tpu.vector_store %arg6[%c0_22, %c0_23, %c0_24], %53 {strides = array<i32>} : memref<1x8x32xf32, #tpu.memory_space<vmem>>, vector<1x8x32xf32>,
    return
  }
  func.func @transform_0(%arg0: i32) -> (i32, i32, i32) {
    %c0_i32 = arith.constant 0 : i32
    %c0_i32_0 = arith.constant 0 : i32
    %c0_i32_1 = arith.constant 0 : i32
    return %arg0, %c0_i32, %c0_i32_0 : i32, i32, i32
  }
  func.func @transform_1(%arg0: i32) -> (i32, i32) {
    %c0_i32 = arith.constant 0 : i32
    %c0_i32_0 = arith.constant 0 : i32
    %c0_i32_1 = arith.constant 0 : i32
    return %c0_i32, %c0_i32_0 : i32, i32
  }
  func.func @transform_2(%arg0: i32) -> (i32, i32) {
    %c0_i32 = arith.constant 0 : i32
    %c0_i32_0 = arith.constant 0 : i32
    %c0_i32_1 = arith.constant 0 : i32
    return %c0_i32, %c0_i32_0 : i32, i32
  }
  func.func @transform_3(%arg0: i32) -> (i32, i32) {
    %c0_i32 = arith.constant 0 : i32
    %c0_i32_0 = arith.constant 0 : i32
    %c0_i32_1 = arith.constant 0 : i32
    return %c0_i32, %c0_i32_0 : i32, i32
  }
  func.func @transform_4(%arg0: i32) -> (i32, i32) {
    %c0_i32 = arith.constant 0 : i32
    %c0_i32_0 = arith.constant 0 : i32
    %c0_i32_1 = arith.constant 0 : i32
    return %c0_i32, %c0_i32_0 : i32, i32
  }
  func.func @transform_5(%arg0: i32) -> (i32, i32, i32) {
    %c0_i32 = arith.constant 0 : i32
    %c0_i32_0 = arith.constant 0 : i32
    %c0_i32_1 = arith.constant 0 : i32
    return %arg0, %c0_i32, %c0_i32_0 : i32, i32, i32
  }
}

</mosaic_0001>

<bundles_post_ra>
// kernel: tpu_custom_call.1
= control target key start
LH: loop header
LB: loop body
LE: loop exit
PB: predicated region body
PF: predicated region fallthrough
CT: control target
= control target key end

     0   :  { %10 = vsyncpa [#allocation3], 0  ;;  %s1151_s0 = inlined_call_operand.hbm [shape: f32[2,8,16], index: 0, kind: input, shape index: {}]   ;;  %s1152_s1 = inlined_call_operand.hbm [shape: f32[16,32], index: 1, kind: input, shape index: {}]   ;;  %s1153_s2 = inlined_call_operand.vmem [shape: f32[1,32], index: 2, kind: input, shape index: {}]   ;;  %s1154_s3 = inlined_call_operand.hbm [shape: f32[32,32], index: 3, kind: input, shape index: {}]   ;;  %s1155_s4 = inlined_call_operand.vmem [shape: f32[1,32], index: 4, kind: input, shape index: {}]   ;;  %s1156_s5 = inlined_call_operand.hbm [shape: f32[2,8,32], index: 5, kind: output, shape index: {}]  }
   0x1   :  { %12 = vsyncpa [#allocation3 + $0x1], 0 }
   0x2   :  { %13 = vsyncpa [#allocation6], 0 }
   0x3   :  { %14 = vsyncpa [#allocation4], 0 }
   0x4   :  { %16 = vsyncpa [#allocation4 + $0x1], 0  ;;  %s907_s18 = smov 0   ;;  %s909_s19 = smov 0  }
   0x5   :  { %s911_s20 = smov 0   ;;  %s913_s21 = smov 0  }
   0x6 LB: > { %s928_s22 = sadd.s32 4294967295, %s866_s21   ;;  %s579_s23 = sadd.s32 4294967294, %s866_s21   ;;  %s866_s21 = sphi %s913_s21, %s1176_s21   ;;  %s862_s20 = sphi %s911_s20, %s1175_s20   ;;  %s858_s19 = sphi %s909_s19, %s1174_s19   ;;  %s854_s18 = sphi %s907_s18, %s1173_s18  }
   0x7   : > { %p42_p0 = scmp.ne.s32.totalorder %s858_s19, %s854_s18  ;;  %p1157_p1 = scmp.eq.s32.totalorder %s928_s22, 0 }
   0x8   : > { %p156_p3 = scmp.eq.s32.totalorder %s579_s23, 1  ;;  %p580_p5 = scmp.ge.s32.totalorder %s866_s21, 1 }
   0x9   : > { %p937_p4 = por %p1157_p1, %p42_p0  ;;  %p163_p7 = scmp.lt.s32.totalorder %s866_s21, 3 }
   0xa   : > { %p942_p6 = por %p156_p3, %p42_p0  ;;  %s868_s27 = smov [#allocation5]  }
   0xb   : > { %s1160_s24 = scalar_select %p937_p4, 1, 0 }
   0xc   : > { %s1161_s25 = scalar_select %p942_p6, 1, 0 }
   0xd   : > { %p947_p8 = pnand %p580_p5, %p163_p7  ;;  %s175_s28 = sshll.u32 %s868_s27, 4  ;;  %s951_s28 = int_to_ptr.vmem [resolvable:$true] %s175_s28 }
   0xe   : > { %s869_s30 = smov [#allocation7]   ;;  %s710_s9 = scalar_lea.hbm %s1152_s1, 256 }
   0xf   : > { %p646_p9 = pneg %p947_p8  ;;  %s191_s6 = sshll.u32 %s869_s30, 4  ;;  %s962_s6 = int_to_ptr.vmem [resolvable:$true] %s191_s6 }
  0x10   : > { %p711_p12 = scmp.ne.s32.totalorder %s1152_s1, %s710_s9  ;;  %p717_p5 = scmp.lt.u32.totalorder %s710_s9, %s1152_s1 }
  0x11   : > { %p958_p11 = pnand %p646_p9, %p1157_p1 }
  0x13   : > { %p712_p13 = pneg %p958_p11 }
  0x15   : > { %p713_p0 = pnand %p712_p13, %p711_p12 }
  0x17   : > { %p714_p3 = pneg %p713_p0 }
  0x19   : > { %p719_p7 = pnand %p717_p5, %p714_p3 }
  0x1b   : > { %722 = shalt.err (!%p719_p7)
}
  0x1c   : > { %s723_s14 = scalar_lea.vmem %s951_s28, 256  ;;  %p731_p2 = scmp.lt.s32.totalorder %s951_s28, %s951_s28 }
  0x1d   : > { %p724_p9 = scmp.ne.s32.totalorder %s951_s28, %s723_s14  ;;  %p732_p12 = scmp.lt.s32.totalorder %s723_s14, %s723_s14 }
  0x1f   : > { %p726_p10 = pnand %p724_p9, %p712_p13  ;;  %p733_p0 = por %p732_p12, %p731_p2 }
  0x21   : > { %p727_p1 = pneg %p726_p10 }
  0x23   : > { %p734_p6 = pnand %p733_p0, %p727_p1 }
  0x25   : > { %737 = shalt.err (!%p734_p6)
}
  0x26   : > { %s870_s15 = smov 128   ;;  %s871_s16 = smov 8  }
  0x27   : > { %649 = dma.hbm_to_vmem [thread:$0]  (!%p958_p11), %s1152_s1, 256, %s951_s28, [#allocation6], %s870_s15, %s870_s15, %s871_s16  }
  0x28   : > { %s738_s7 = scalar_lea.hbm %s1154_s3, 512 }
  0x29   : > { %p739_p2 = scmp.ne.s32.totalorder %s1154_s3, %s738_s7  ;;  %p745_p10 = scmp.lt.u32.totalorder %s738_s7, %s1154_s3 }
  0x2b   : > { %p741_p1 = pnand %p739_p2, %p712_p13 }
  0x2d   : > { %p742_p6 = pneg %p741_p1 }
  0x2f   : > { %p747_p3 = pnand %p745_p10, %p742_p6 }
  0x31   : > { %750 = shalt.err (!%p747_p3)
}
  0x32   : > { %s751_s28 = scalar_lea.vmem %s962_s6, 512  ;;  %p759_p12 = scmp.lt.s32.totalorder %s962_s6, %s962_s6 }
  0x33   : > { %p752_p5 = scmp.ne.s32.totalorder %s962_s6, %s751_s28  ;;  %p760_p0 = scmp.lt.s32.totalorder %s751_s28, %s751_s28 }
  0x35   : > { %p754_p7 = pnand %p752_p5, %p712_p13  ;;  %p761_p2 = por %p760_p0, %p759_p12 }
  0x37   : > { %p755_p9 = pneg %p754_p7 }
  0x39   : > { %p762_p1 = pnand %p761_p2, %p755_p9 }
  0x3b   : > { %765 = shalt.err (!%p762_p1)
}
  0x3c   : > { %652 = dma.hbm_to_vmem [thread:$0]  (!%p958_p11), %s1154_s3, 512, %s962_s6, [#allocation6], %s870_s15, %s870_s15, %s871_s16  }
  0x3d   : > { %s1017_s14 = sadd.s32 1, %s866_s21   ;;  %s29_s29 = sadd.s32 1, %s862_s20 }
  0x3e   : > { %s26_s17 = ssub.s32 %s866_s21, %s1017_s14  ;;  %p36_p13 = scmp.ne.s32.totalorder %s862_s20, %s858_s19 }
  0x3f   : > { %p27_p6 = scmp.eq.s32.totalorder %s26_s17, 0  ;;  %p37_p10 = scmp.eq.s32.totalorder %s866_s21, 0 }
  0x40   : > { %p1164_p3 = scmp.eq.s32.totalorder %s928_s22, 1  ;;  %p663_p7 = scmp.lt.s32.totalorder %s866_s21, 2 }
  0x41   : > { %s1033_s27 = scalar_select %p27_p6, %s862_s20, %s29_s29  }
  0x42   : > { %p1027_p5 = por %p1164_p3, %p36_p13  ;;  %p38_p9 = por %p37_p10, %p36_p13 }
  0x43   : > { %s208_s30 = sand.u32 1, %s862_s20   ;;  %s585_s6 = sshll.u32 %s866_s21, 7 }
  0x44   : > { %s1165_s23 = scalar_select %p1027_p5, 1, 0 }
  0x45   : > { %s584_s7 = sshll.u32 %s208_s30, 3  ;;  %s1040_s8 = scalar_lea.hbm %s1151_s0, %s585_s6 }
  0x46   : > { %s212_s9 = scalar_lea.vmem [#allocation2], %s584_s7  ;;  %p1044_p11 = pnand %p663_p7, %p38_p9 }
  0x47   : > { %s219_s10 = sshll.u32 %s212_s9, 4  ;;  %s209_s28 = scalar_lea.sflag [#allocation3], %s208_s30  ;;  %s1042_s10 = int_to_ptr.vmem [resolvable:$true] %s219_s10 }
  0x48   : > { %s766_s12 = scalar_lea.hbm %s1040_s8, 128  ;;  %p768_p0 = pneg %p1044_p11 }
  0x49   : > { %p767_p12 = scmp.ne.s32.totalorder %s1040_s8, %s766_s12  ;;  %s771_s17 = scalar_lea.hbm %s1151_s0, 256 }
  0x4a   : > { %p772_p13 = scmp.lt.u32.totalorder %s1040_s8, %s1151_s0  ;;  %p773_p6 = scmp.lt.u32.totalorder %s771_s17, %s766_s12 }
  0x4b   : > { %p769_p2 = pnand %p768_p0, %p767_p12  ;;  %p775_p3 = scmp.lt.u32.totalorder %s766_s12, %s1040_s8 }
  0x4c   : > { %p774_p10 = por %p773_p6, %p772_p13 }
  0x4d   : > { %p770_p1 = pneg %p769_p2 }
  0x4e   : > { %p776_p7 = por %p775_p3, %p774_p10 }
  0x50   : > { %p777_p9 = pnand %p776_p7, %p770_p1 }
  0x52   : > { %780 = shalt.err (!%p777_p9)
}
  0x53   : > { %s781_s30 = scalar_lea.vmem %s1042_s10, 128  ;;  %s872_s15 = smov [#allocation2]  }
  0x54   : > { %p782_p12 = scmp.ne.s32.totalorder %s1042_s10, %s781_s30  ;;  %s786_s16 = sshll.u32 %s872_s15, 4  ;;  %s787_s16 = int_to_ptr.vmem [resolvable:$false] %s786_s16 }
  0x55   : > { %s788_s9 = scalar_lea.vmem %s787_s16, 256  ;;  %p789_p4 = scmp.lt.s32.totalorder %s1042_s10, %s787_s16 }
  0x56   : > { %p784_p2 = pnand %p782_p12, %p768_p0  ;;  %p790_p13 = scmp.lt.s32.totalorder %s788_s9, %s781_s30 }
  0x58   : > { %p785_p5 = pneg %p784_p2  ;;  %p791_p6 = por %p790_p13, %p789_p4 }
  0x5a   : > { %p792_p10 = pnand %p791_p6, %p785_p5 }
  0x5c   : > { %795 = shalt.err (!%p792_p10)
}
  0x5d   : > { %656 = dma.hbm_to_vmem [thread:$0]  (!%p1044_p11), %s1040_s8, 128, %s1042_s10, %s209_s28  }
  0x5e   : > { %228 = sbr.rel (%p947_p8) target bundleno = 757 (0x2f5), region = 40  ;;  %s1076_s12 = sand.u32 (!%p947_p8), 1, %s858_s19  }
  0x5f   : > { %s587_s13 = sshll.u32 (!%p947_p8), %s1076_s12, 3  ;;  %s231_s29 = scalar_lea.sflag (!%p947_p8), [#allocation3], %s1076_s12 }
  0x60   : > { %s234_s17 = scalar_lea.vmem (!%p947_p8), [#allocation2], %s587_s13  ;;  %p1167_p4 = scmp.ne.s32.totalorder (!%p947_p8), %s1160_s24, 0 }
  0x65   : > { %841 = dma.done.wait (%p1167_p4), %s231_s29, 128  }
  0x66   : > { %843 = vsyncadd (%p1167_p4), %s231_s29, 4294967168  ;;  %p1168_p5 = scmp.eq.s32.totalorder %s928_s22, 0 }
  0x68   : > { %845 = dma.done.wait (%p1168_p5), [#allocation6], 768   ;;  %p1169_p8 = pmov %p1168_p5 }
  0x69   : > { %v873_v0 = vmov 0.0|0.0   ;;  %vm874_vm0 = vmmov 0   ;;  %v875_v1 = vmov 0.0   ;;  %v270_v2 = vld [vmem:[#allocation5] sm:$0xff]  ;;  %v271_v3 = vld [vmem:[#allocation5 + $0x8] sm:$0xff]  ;;  %v269_v5 = vld [vmem:[%s234_s17] sm:$0xff] }
  0x6a   : > { %847 = vsyncadd (%p1169_p8), [#allocation6], 4294966528  ;;  %625 = vmatprep.subr.bf16.mxu0 %v873_v0  ;;  %611 = vmatprep.mubr.msk.f32.mxu0 %vm874_vm0, %v875_v1  ;;  %v626_v4 = vpack.c.bf16 %v271_v3, %v270_v2  ;;  %vm279_vm1 = vcmask 130048   ;;  %v384_v6 = vld [vmem:[#allocation7] sm:$0xff]  ;;  %v385_v7 = vld [vmem:[#allocation7 + $0x8] sm:$0xff]  ;;  %vm353_vm2 = vcmask 261120  }
  0x6b   : > { %628 = vmatprep.subr.bf16.mxu1 %v873_v0  ;;  %622 = vmatprep.mubr.msk.f32.mxu1 %vm874_vm0, %v875_v1  ;;  %v629_v8 = vpack.c.bf16 %v385_v7, %v384_v6  ;;  %v386_v9 = vld [vmem:[#allocation7 + $0x10] sm:$0xff]  ;;  %v387_v10 = vld [vmem:[#allocation7 + $0x18] sm:$0xff]  ;;  %v591_v12 = vld [vmem:[%s1153_s2] ss:$0 sm:$0xff]  ;;  %s596_s11 = sshll.u32 %s928_s22, 7  ;;  %s268_s28 = scalar_lea.vmem [#allocation8], %s587_s13 }
  0x6c   : > { %627 = vmatpush3.bf16.msra.mxu0 %v626_v4  ;;  %v632_v11 = vpack.c.bf16 %v387_v10, %v386_v9  ;;  %v593_v46 = vld [vmem:[%s1155_s4] ss:$0 sm:$0xff]  ;;  %s490_s7 = sshll.u32 %s268_s28, 4  ;;  %s1106_s15 = scalar_lea.hbm %s1156_s5, %s596_s11  ;;  %s1108_s7 = int_to_ptr.vmem [resolvable:$true] %s490_s7 }
  0x6d   : > { %630 = vmatpush3.bf16.msra.mxu1 %v629_v8  ;;  %s477_s16 = scalar_lea.sflag [#allocation4], %s1076_s12  ;;  %s796_s9 = scalar_lea.vmem %s1108_s7, 128 }
  0x6e   : > { %631 = vmatprep.subr.bf16.mxu1 %v873_v0  ;;  %p797_p11 = scmp.ne.s32.totalorder %s1108_s7, %s796_s9  ;;  %p1170_p0 = scmp.ne.s32.totalorder %s1165_s23, 0 }
  0x6f   : > { %612 = vmatmul.mubr.msk.f32.vlgmr.msra.gmra.mrb[0].mxu0 %vm279_vm1, %v269_v5  ;;  %s876_s22 = smov [#allocation8]  }
  0x70   : > { %p798_p1 = pnand %p797_p11, %p1170_p0  ;;  %s800_s13 = sshll.u32 %s876_s22, 4  ;;  %s801_s13 = int_to_ptr.vmem [resolvable:$false] %s800_s13 }
  0x71   : > { %633 = vmatpush3.bf16.msra.mxu1 %v632_v11  ;;  %s802_s29 = scalar_lea.vmem %s801_s13, 256  ;;  %p803_p7 = scmp.lt.s32.totalorder %s1108_s7, %s801_s13 }
  0x72   : > { %p799_p3 = pneg %p798_p1  ;;  %p804_p9 = scmp.lt.s32.totalorder %s802_s29, %s796_s9 }
  0x74   : > { %p805_p12 = por %p804_p9, %p803_p7 }
  0x76   : > { %p806_p2 = pnand %p805_p12, %p799_p3 }
 0x142   : > { %v349_v13 = vpop.f32.mrb[0].mxu0 }
 0x143   : > { %v350_v14 = vadd.f32 %v591_v12, %v349_v13  ;;  %v613_v15 = vpop.f32.mrb[1].mxu0 }
 0x145   : > { %v354_v16 = vsel %vm353_vm2, %v350_v14, 0.0  ;;  %v361_v17 = vmul.f32 %v350_v14, %v350_v14 }
 0x146   : > { %v355_v18 = vrot.slane %v354_v16, 4 }
 0x147   : > { %v362_v19 = vsel %vm353_vm2, %v361_v17, 0.0 }
 0x148   : > { %v356_v20 = vadd.f32 %v355_v18, %v354_v16  ;;  %v363_v21 = vrot.slane %v362_v19, 4 }
 0x14a   : > { %v357_v22 = vrot.slane %v356_v20, 2  ;;  %v364_v23 = vadd.f32 %v363_v21, %v362_v19 }
 0x14c   : > { %v358_v24 = vadd.f32 %v357_v22, %v356_v20  ;;  %v365_v25 = vrot.slane %v364_v23, 2 }
 0x14e   : > { %v359_v26 = vrot.slane %v358_v24, 1  ;;  %v366_v27 = vadd.f32 %v365_v25, %v364_v23 }
 0x150   : > { %v360_v28 = vadd.f32 %v359_v26, %v358_v24  ;;  %v367_v29 = vrot.slane %v366_v27, 1 }
 0x152   : > { %v368_v30 = vadd.f32 %v367_v29, %v366_v27  ;;  %v369_v31 = vmul.f32 0.125, %v360_v28 }
 0x154   : > { %v370_v32 = vmul.f32 0.125, %v368_v30  ;;  %v371_v33 = vmul.f32 %v369_v31, %v369_v31  ;;  %v374_v37 = vsub.f32 %v350_v14, %v369_v31 }
 0x156   : > { %v372_v34 = vsub.f32 %v370_v32, %v371_v33 }
 0x158   : > { %v373_v35 = vmax.f32 %v372_v34, 0.0 }
 0x15a   : > { %v375_v36 = vadd.f32 1e-05, %v373_v35 }
 0x15c   : > { %706 = vrsqrt.f32 %v375_v36 }
 0x166   : > { %v707_v38 = vpop.eup %706 }
 0x167   : > { %v377_v39 = vmul.f32 %v707_v38, %v374_v37 }
 0x169   : > { %v378_v40 = vsub.f32 %v377_v39, %v591_v12  ;;  %v380_v41 = vsub.f32 0.0, %v377_v39 }
 0x16b   : > { %v381_v42 = vsub.f32 %v380_v41, %v591_v12  ;;  %v379_v43 = vmax.f32 %v378_v40, 0.0 }
 0x16d   : > { %v382_v44 = vmax.f32 %v381_v42, 0.0 }
 0x16f   : > { %v383_v45 = vsub.f32 %v379_v43, %v382_v44 }
 0x171   : > { %623 = vmatmul.mubr.msk.f32.vlgmr.msra.gmra.mrb[0].mxu1 %vm353_vm2, %v383_v45 }
 0x244   : > { %v464_v47 = vpop.f32.mrb[0].mxu1 }
 0x245   : > { %v465_v48 = vadd.f32 %v593_v46, %v464_v47  ;;  %v624_v49 = vpop.f32.mrb[1].mxu1 }
 0x247   : > { %v468_v50 = vmul.f32 %v465_v48, %v465_v48 }
 0x249   : > { %v469_v51 = vsel %vm353_vm2, %v468_v50, 0.0 }
 0x24a   : > { %470 = vadd.xlane.f32.xlu0 %v469_v51 }
 0x2d7   : > { %v471_v52 = vpop.xlane.xlu0 %470 }
 0x2d8   : > { %v472_v53 = vadd.f32 1e-12, %v471_v52 }
 0x2da   : > { %708 = vrsqrt.f32 %v472_v53 }
 0x2e4   : > { %v709_v54 = vpop.eup %708 }
 0x2e5   : > { %v474_v55 = vmul.f32 %v709_v54, %v465_v48 }
 0x2e7   : > { %475 = vst.msk [vmem:[%s268_s28] sm:$0xff] %vm353_vm2, %v474_v55 }
 0x2e8   : > { %809 = shalt.err (!%p806_p2)
}
 0x2e9   : > { %s810_s12 = scalar_lea.hbm %s1106_s15, 128  ;;  %s814_s26 = scalar_lea.hbm %s1156_s5, 256 }
 0x2ea   : > { %p811_p13 = scmp.ne.s32.totalorder %s1106_s15, %s810_s12  ;;  %p815_p4 = scmp.lt.u32.totalorder %s1106_s15, %s1156_s5 }
 0x2eb   : > { %p816_p5 = scmp.lt.u32.totalorder %s814_s26, %s810_s12  ;;  %p818_p11 = scmp.lt.u32.totalorder %s810_s12, %s1106_s15 }
 0x2ec   : > { %p812_p6 = pnand %p811_p13, %p1170_p0 }
 0x2ed   : > { %p817_p8 = por %p816_p5, %p815_p4 }
 0x2ee   : > { %p813_p10 = pneg %p812_p6 }
 0x2ef   : > { %p819_p1 = por %p818_p11, %p817_p8 }
 0x2f1   : > { %p820_p3 = pnand %p819_p1, %p813_p10 }
 0x2f3   : > { %823 = shalt.err (!%p820_p3)
}
 0x2f4   : > { %644 = dma.vmem_to_hbm [thread:$0]  (%p1170_p0), %s1108_s7, 128, %s1106_s15, %s477_s16  }
 0x2f5 PF: > { %s502_s11 = sand.u32 1, %s854_s18   ;;  %p1171_p7 = scmp.ne.s32.totalorder %s1161_s25, 0 }
 0x2f6   : > { %p1172_p9 = scmp.ge.s32.totalorder %s866_s21, 2  ;;  %s503_s28 = scalar_lea.sflag [#allocation4], %s502_s11 }
 0x2f8   : > { %p658_p12 = pnand %p1172_p9, %p1171_p7 }
 0x2fa   : > { %849 = dma.done.wait (!%p658_p12), %s503_s28, 128  }
 0x2fb   : > { %851 = vsyncadd (!%p658_p12), %s503_s28, 4294967168  ;;  %p19_p2 = scmp.ge.s32.totalorder %s1017_s14, 4   ;;  %s1173_s18 = smov %s858_s19 }
 0x2fc   : > { %s1174_s19 = smov %s862_s20  ;;  %s1175_s20 = smov %s1033_s27 }
 0x2fd   : > { %s1176_s21 = smov %s1017_s14  ;;  %21 = sbr.rel (!%p19_p2) target bundleno = 6 (0x6), region = 93 }
 0x304   :  { %508 = vsyncpa [#allocation3], 1 }
 0x305   :  { %510 = vsyncpa [#allocation3 + $0x1], 1 }
 0x306   :  { %511 = vsyncpa [#allocation6], 1 }
 0x307   :  { %512 = vsyncpa [#allocation4], 1 }
 0x308   :  { %514 = vsyncpa [#allocation4 + $0x1], 1 }

</bundles_post_ra>
